<compile_context>
chip_gen: v7x
topology: tpu7x:2x2x1
jax: 0.10.0
libtpu: 0.0.40
codegen_flags: <defaults>
</compile_context>

<pallas_src>
import jax
import jax.numpy as jnp
from jax import lax
from jax.experimental import pallas as pl
from jax.experimental.pallas import tpu as pltpu


def _round_up(x, m):
    return ((x + m - 1) // m) * m


# ---- dispatch thresholds for the VMEM-resident fast path --------------------
_MAX_ONEHOT_ROWS = 2048                       # keeps the (TB, N) one-hot small
_RESIDENT_VMEM_BUDGET = 40 * 1024 * 1024      # conservative for v7x (64 MiB VMEM/TC)
_RESIDENT_VMEM_LIMIT = 48 * 1024 * 1024       # > v5e/v6e scoped defaults, < v7x physical


def _cosine_rows_to_lane(u, v, eps=1e-8):
    """u, v: (TB, D) f32 -> (1, TB) cosine similarities (lane-dense)."""
    tb, d = u.shape
    # Fused reductions: one (1,D) . (3*TB,D)^T MXU matmul instead of three.
    stacked = jnp.concatenate([u * v, u * u, v * v], axis=0)          # (3TB, D)
    ones_row = jnp.ones((1, d), jnp.float32)
    sums = lax.dot_general(ones_row, stacked, (((1,), (1,)), ((), ())),
                           precision=lax.Precision.HIGHEST,
                           preferred_element_type=jnp.float32)        # (1, 3TB)
    dot = sums[:, :tb]
    u2 = sums[:, tb:2 * tb]
    v2 = sums[:, 2 * tb:]
    e = jnp.float32(eps)
    # dot / max(|u||v|, eps) == dot * rsqrt(max(|u|^2|v|^2, eps^2))   (EUP rsqrt)
    return dot * lax.rsqrt(jnp.maximum(u2 * v2, e * e))


# =============================================================================
# Fast path: tables resident in VMEM, one-hot MXU gather (no per-row DMAs).
# =============================================================================
def _resident_kernel(u_idx_ref, i_idx_ref,      # (TB, 1) int32 index blocks (VMEM)
                     u_tab_ref, i_tab_ref,      # full tables (VMEM)
                     out_ref):                  # (1, TB) output block
    tb = out_ref.shape[1]
    n_u, d = u_tab_ref.shape
    n_i = i_tab_ref.shape[0]

    def gather(idx_ref, tab_ref, n):
        idx = idx_ref[...]                                              # (TB, 1)
        oh = (idx == lax.broadcasted_iota(jnp.int32, (tb, n), 1))
        oh = oh.astype(jnp.float32)                                     # (TB, N)
        return jnp.dot(oh, tab_ref[...].astype(jnp.float32),
                       precision=lax.Precision.HIGHEST,
                       preferred_element_type=jnp.float32)              # (TB, D)

    u = gather(u_idx_ref, u_tab_ref, n_u)
    v = gather(i_idx_ref, i_tab_ref, n_i)
    out_ref[...] = _cosine_rows_to_lane(u, v)


# =============================================================================
# General path: tables in HBM, per-row DMA gather, double-buffered across steps.
# =============================================================================
def _hbm_gather_kernel(u_idx_ref, i_idx_ref,    # scalar-prefetch indices (SMEM)
                       u_tab_ref, i_tab_ref,    # embedding tables (HBM / ANY)
                       out_ref,                 # (1, TB) output block (VMEM)
                       u_buf, i_buf, sem):      # (2,TB,D) x2 scratch + (2,2) DMA sems
    s = pl.program_id(0)
    nb = pl.num_programs(0)
    _, tb, d = u_buf.shape

    def issue_block(block, slot):
        base = block * tb

        def _start(r, carry):
            u_row = u_idx_ref[base + r]
            i_row = i_idx_ref[base + r]
            pltpu.make_async_copy(u_tab_ref.at[u_row], u_buf.at[slot, r],
                                  sem.at[slot, 0]).start()
            pltpu.make_async_copy(i_tab_ref.at[i_row], i_buf.at[slot, r],
                                  sem.at[slot, 1]).start()
            return carry

        # Unrolled so SMEM index loads co-issue with descriptor pushes.
        lax.fori_loop(0, tb, _start, 0, unroll=8)

    # Prologue: prime slot 0 with block 0.
    @pl.when(s == 0)
    def _():
        issue_block(0, 0)

    slot = s & 1

    # Aggregate waits: one descriptor covering the whole (TB, D) destination
    # buffer drains all TB row copies (byte-based semaphore accounting) and
    # makes the dependency on the full buffer explicit.
    pltpu.make_async_copy(u_buf.at[slot], u_buf.at[slot], sem.at[slot, 0]).wait()
    pltpu.make_async_copy(i_buf.at[slot], i_buf.at[slot], sem.at[slot, 1]).wait()

    # Prefetch next block into the other slot before computing (overlaps the
    # gather DMAs with this block's compute + output writeback).
    @pl.when(s + 1 < nb)
    def _():
        issue_block(s + 1, 1 - slot)

    u = u_buf[slot].astype(jnp.float32)          # (TB, D)
    v = i_buf[slot].astype(jnp.float32)          # (TB, D)
    out_ref[...] = _cosine_rows_to_lane(u, v)


# =============================================================================
# Wrapper
# =============================================================================
def embed_matcher_forward(user_table, item_table, query_users, query_items,
                          *, block_b=512, force_hbm_gather=False):
    """Equivalent of EmbedMatcher.forward(query_users, query_items) -> (B,) cosine sims."""
    B = int(query_users.shape[0])
    n_users, D = user_table.shape
    n_items, D2 = item_table.shape
    assert D == D2, "user/item embedding dims must match"

    # Queries per grid step: single block for small batches, otherwise a
    # lane-dense multiple of 128 (unmasked vst on the (1, TB) output block).
    if B <= block_b:
        tb = _round_up(max(B, 1), 8)
    else:
        tb = _round_up(block_b, 128)
    b_pad = _round_up(B, tb)
    nb = b_pad // tb

    # Clamp (no runtime OOB check on TPU DMAs / gathers) and pad to whole blocks.
    u_idx = jnp.clip(query_users.astype(jnp.int32), 0, n_users - 1)
    i_idx = jnp.clip(query_items.astype(jnp.int32), 0, n_items - 1)
    u_idx = jnp.pad(u_idx, (0, b_pad - B))
    i_idx = jnp.pad(i_idx, (0, b_pad - B))

    # ---- choose path -------------------------------------------------------
    itemsize = jnp.dtype(user_table.dtype).itemsize
    tab_bytes = (n_users + n_items) * D * itemsize
    onehot_bytes = tb * (n_users + n_items) * 4
    work_bytes = 10 * tb * D * 4                     # gathered rows + products + stacked
    vmem_est = 2 * tab_bytes + onehot_bytes + work_bytes
    resident = (not force_hbm_gather
                and n_users <= _MAX_ONEHOT_ROWS
                and n_items <= _MAX_ONEHOT_ROWS
                and vmem_est <= _RESIDENT_VMEM_BUDGET)

    if resident:
        out = pl.pallas_call(
            _resident_kernel,
            out_shape=jax.ShapeDtypeStruct((1, b_pad), jnp.float32),
            grid_spec=pltpu.PrefetchScalarGridSpec(
                num_scalar_prefetch=0,
                grid=(nb,),
                in_specs=[
                    pl.BlockSpec((tb, 1), lambda s: (s, 0)),          # user indices
                    pl.BlockSpec((tb, 1), lambda s: (s, 0)),          # item indices
                    pl.BlockSpec((n_users, D), lambda s: (0, 0)),     # user table (VMEM-resident)
                    pl.BlockSpec((n_items, D), lambda s: (0, 0)),     # item table (VMEM-resident)
                ],
                out_specs=pl.BlockSpec((1, tb), lambda s: (0, s)),
            ),
            compiler_params=pltpu.CompilerParams(
                dimension_semantics=("parallel",),          # no cross-step state -> megacore OK
                vmem_limit_bytes=_RESIDENT_VMEM_LIMIT),
        )(u_idx.reshape(b_pad, 1), i_idx.reshape(b_pad, 1), user_table, item_table)
    else:
        out = pl.pallas_call(
            _hbm_gather_kernel,
            out_shape=jax.ShapeDtypeStruct((1, b_pad), jnp.float32),
            grid_spec=pltpu.PrefetchScalarGridSpec(
                num_scalar_prefetch=2,                      # query_users, query_items -> SMEM
                grid=(nb,),
                in_specs=[
                    pl.BlockSpec(memory_space=pl.ANY),      # user table stays in HBM
                    pl.BlockSpec(memory_space=pl.ANY),      # item table stays in HBM
                ],
                out_specs=pl.BlockSpec((1, tb), lambda s, uidx, iidx: (0, s)),
                scratch_shapes=[
                    pltpu.VMEM((2, tb, D), user_table.dtype),   # double-buffered user rows
                    pltpu.VMEM((2, tb, D), item_table.dtype),   # double-buffered item rows
                    pltpu.SemaphoreType.DMA((2, 2)),            # [slot, {user,item}]
                ],
            ),
            # Cross-step double buffering carries scratch/semaphore state, so the
            # grid axis must run sequentially on one core.
            compiler_params=pltpu.CompilerParams(
                dimension_semantics=("arbitrary",)),
        )(u_idx, i_idx, user_table, item_table)

    return out.reshape(b_pad)[:B]


# =============================================================================
# Reference + self-test
# =============================================================================
def _reference(user_table, item_table, query_users, query_items, eps=1e-8):
    u = user_table[query_users]
    v = item_table[query_items]
    dot = jnp.sum(u * v, axis=1)
    nu = jnp.sqrt(jnp.sum(u * u, axis=1))
    nv = jnp.sqrt(jnp.sum(v * v, axis=1))
    return dot / jnp.maximum(nu * nv, eps)


if __name__ == "__main__":
    key = jax.random.PRNGKey(0)

    # ---- test 1: VMEM-resident fast path, single block ----
    k_u, k_i, k_qu, k_qi = jax.random.split(key, 4)
    num_users, num_items, embed_dim, batch = 16, 16, 32, 8
    user_table = jax.random.normal(k_u, (num_users, embed_dim), dtype=jnp.float32)
    item_table = jax.random.normal(k_i, (num_items, embed_dim), dtype=jnp.float32)
    query_users = jax.random.randint(k_qu, (batch,), 0, num_users, dtype=jnp.int32)
    query_items = jax.random.randint(k_qi, (batch,), 0, num_items, dtype=jnp.int32)

    out = embed_matcher_forward(user_table, item_table, query_users, query_items)
    out = jax.block_until_ready(out)
    ref = _reference(user_table, item_table, query_users, query_items)
    assert out.shape == (batch,)
    assert jnp.allclose(out, ref, atol=1e-4, rtol=1e-4), (out, ref)

    # ---- test 2: VMEM-resident path, multi-block (megacore-parallel axis) ----
    k2 = jax.random.split(jax.random.PRNGKey(1), 4)
    n_u2, n_i2, d2, b2 = 64, 48, 64, 200
    ut2 = jax.random.normal(k2[0], (n_u2, d2), dtype=jnp.float32)
    it2 = jax.random.normal(k2[1], (n_i2, d2), dtype=jnp.float32)
    qu2 = jax.random.randint(k2[2], (b2,), 0, n_u2, dtype=jnp.int32)
    qi2 = jax.random.randint(k2[3], (b2,), 0, n_i2, dtype=jnp.int32)
    out2 = jax.block_until_ready(
        embed_matcher_forward(ut2, it2, qu2, qi2, block_b=128))
    ref2 = _reference(ut2, it2, qu2, qi2)
    assert out2.shape == (b2,)
    assert jnp.allclose(out2, ref2, atol=1e-4, rtol=1e-4), (out2, ref2)

    # ---- test 3: HBM per-row DMA gather path, 3 blocks (double buffering) ----
    k3 = jax.random.split(jax.random.PRNGKey(2), 4)
    n_u3, n_i3, d3, b3 = 64, 48, 64, 300
    ut3 = jax.random.normal(k3[0], (n_u3, d3), dtype=jnp.float32)
    it3 = jax.random.normal(k3[1], (n_i3, d3), dtype=jnp.float32)
    qu3 = jax.random.randint(k3[2], (b3,), 0, n_u3, dtype=jnp.int32)
    qi3 = jax.random.randint(k3[3], (b3,), 0, n_i3, dtype=jnp.int32)
    out3 = jax.block_until_ready(
        embed_matcher_forward(ut3, it3, qu3, qi3, block_b=128,
                              force_hbm_gather=True))
    ref3 = _reference(ut3, it3, qu3, qi3)
    assert out3.shape == (b3,)
    assert jnp.allclose(out3, ref3, atol=1e-4, rtol=1e-4), (out3, ref3)

    print("KERNEL_OK")
</pallas_src>

<mosaic_0001>
module attributes {stable_mosaic.version = 11 : i64} {
  func.func @_resident_kernel(%arg0: i32, %arg1: memref<8x1xi32, #tpu.memory_space<vmem>>, %arg2: memref<8x1xi32, #tpu.memory_space<vmem>>, %arg3: memref<16x32xf32, #tpu.memory_space<vmem>>, %arg4: memref<16x32xf32, #tpu.memory_space<vmem>>, %arg5: memref<1x8xf32, #tpu.memory_space<vmem>>) attributes {dimension_semantics = [#tpu.dimension_semantics<parallel>], iteration_bounds = array<i64: 1>, scalar_prefetch = 0 : i64, scratch_operands = 0 : i64, tpu.core_type = #tpu.core_type<tc>, window_params = [{transform_indices = @transform_0, window_bounds = array<i64: 8, 1>}, {transform_indices = @transform_1, window_bounds = array<i64: 8, 1>}, {pipeline_mode = #tpu.pipeline_mode<synchronous>, transform_indices = @transform_2, window_bounds = array<i64: 16, 32>}, {pipeline_mode = #tpu.pipeline_mode<synchronous>, transform_indices = @transform_3, window_bounds = array<i64: 16, 32>}, {transform_indices = @transform_4, window_bounds = array<i64: 1, 8>}]} {
    %c0 = arith.constant 0 : index
    %c0_0 = arith.constant 0 : index
    %0 = vector.load %arg1[%c0, %c0_0] : memref<8x1xi32, #tpu.memory_space<vmem>>, vector<8x1xi32>
    %1 = tpu.iota {dimensions = array<i32: 1>} : vector<8x16xi32>
    %2 = vector.broadcast %0 : vector<8x1xi32> to vector<8x16xi32>
    %3 = arith.cmpi eq, %2, %1 : vector<8x16xi32>
    %4 = arith.extui %3 : vector<8x16xi1> to vector<8x16xi32>
    %5 = arith.sitofp %4 : vector<8x16xi32> to vector<8x16xf32>
    %c0_1 = arith.constant 0 : index
    %c0_2 = arith.constant 0 : index
    %6 = vector.load %arg3[%c0_1, %c0_2] : memref<16x32xf32, #tpu.memory_space<vmem>>, vector<16x32xf32>
    %cst = arith.constant dense<0.000000e+00> : vector<8x32xf32>
    %7 = tpu.matmul %5, %6, %cst {dimension_numbers = #tpu.dot_dimension_numbers<[1], [0], [0], [1], [0, 0, 1, 1], [], []>, precision = #tpu.contract_precision<fp32>} : vector<8x16xf32>, vector<16x32xf32>, vector<8x32xf32> -> vector<8x32xf32>
    %c0_3 = arith.constant 0 : index
    %c0_4 = arith.constant 0 : index
    %8 = vector.load %arg2[%c0_3, %c0_4] : memref<8x1xi32, #tpu.memory_space<vmem>>, vector<8x1xi32>
    %9 = tpu.iota {dimensions = array<i32: 1>} : vector<8x16xi32>
    %10 = vector.broadcast %8 : vector<8x1xi32> to vector<8x16xi32>
    %11 = arith.cmpi eq, %10, %9 : vector<8x16xi32>
    %12 = arith.extui %11 : vector<8x16xi1> to vector<8x16xi32>
    %13 = arith.sitofp %12 : vector<8x16xi32> to vector<8x16xf32>
    %c0_5 = arith.constant 0 : index
    %c0_6 = arith.constant 0 : index
    %14 = vector.load %arg4[%c0_5, %c0_6] : memref<16x32xf32, #tpu.memory_space<vmem>>, vector<16x32xf32>
    %cst_7 = arith.constant dense<0.000000e+00> : vector<8x32xf32>
    %15 = tpu.matmul %13, %14, %cst_7 {dimension_numbers = #tpu.dot_dimension_numbers<[1], [0], [0], [1], [0, 0, 1, 1], [], []>, precision = #tpu.contract_precision<fp32>} : vector<8x16xf32>, vector<16x32xf32>, vector<8x32xf32> -> vector<8x32xf32>
    %16 = arith.mulf %7, %15 : vector<8x32xf32>
    %17 = arith.mulf %7, %7 : vector<8x32xf32>
    %18 = arith.mulf %15, %15 : vector<8x32xf32>
    %19 = tpu.concatenate %16, %17, %18 in 0 : vector<8x32xf32>, vector<8x32xf32>, vector<8x32xf32> -> vector<24x32xf32>
    %cst_8 = arith.constant 1.000000e+00 : f32
    %20 = vector.broadcast %cst_8 : f32 to vector<1x32xf32>
    %cst_9 = arith.constant dense<0.000000e+00> : vector<1x24xf32>
    %21 = tpu.matmul %20, %19, %cst_9 {dimension_numbers = #tpu.dot_dimension_numbers<[1], [1], [0], [0], [0, 0, 1, 0], [], []>, precision = #tpu.contract_precision<fp32>} : vector<1x32xf32>, vector<24x32xf32>, vector<1x24xf32> -> vector<1x24xf32>
    %22 = vector.extract_strided_slice %21 {offsets = [0, 0], sizes = [1, 8], strides = [1, 1]} : vector<1x24xf32> to vector<1x8xf32>
    %23 = vector.extract_strided_slice %21 {offsets = [0, 8], sizes = [1, 8], strides = [1, 1]} : vector<1x24xf32> to vector<1x8xf32>
    %24 = vector.extract_strided_slice %21 {offsets = [0, 16], sizes = [1, 8], strides = [1, 1]} : vector<1x24xf32> to vector<1x8xf32>
    %25 = arith.mulf %23, %24 : vector<1x8xf32>
    %cst_10 = arith.constant 9.99999993E-9 : f32
    %cst_11 = arith.constant 9.99999993E-9 : f32
    %26 = arith.mulf %cst_10, %cst_11 : f32
    %27 = vector.broadcast %26 : f32 to vector<1x8xf32>
    %28 = arith.maximumf %25, %27 : vector<1x8xf32>
    %29 = math.rsqrt %28 : vector<1x8xf32>
    %30 = arith.mulf %22, %29 : vector<1x8xf32>
    %c0_12 = arith.constant 0 : index
    %c0_13 = arith.constant 0 : index
    %31 = vector.load %arg5[%c0_12, %c0_13] : memref<1x8xf32, #tpu.memory_space<vmem>>, vector<1x8xf32>
    tpu.vector_store %arg5[%c0_12, %c0_13], %30 {strides = array<i32>} : memref<1x8xf32, #tpu.memory_space<vmem>>, vector<1x8xf32>,
    return
  }
  func.func @transform_0(%arg0: i32) -> (i32, i32) {
    %c0_i32 = arith.constant 0 : i32
    %c0_i32_0 = arith.constant 0 : i32
    return %arg0, %c0_i32 : i32, i32
  }
  func.func @transform_1(%arg0: i32) -> (i32, i32) {
    %c0_i32 = arith.constant 0 : i32
    %c0_i32_0 = arith.constant 0 : i32
    return %arg0, %c0_i32 : i32, i32
  }
  func.func @transform_2(%arg0: i32) -> (i32, i32) {
    %c0_i32 = arith.constant 0 : i32
    %c0_i32_0 = arith.constant 0 : i32
    %c0_i32_1 = arith.constant 0 : i32
    return %c0_i32, %c0_i32_0 : i32, i32
  }
  func.func @transform_3(%arg0: i32) -> (i32, i32) {
    %c0_i32 = arith.constant 0 : i32
    %c0_i32_0 = arith.constant 0 : i32
    %c0_i32_1 = arith.constant 0 : i32
    return %c0_i32, %c0_i32_0 : i32, i32
  }
  func.func @transform_4(%arg0: i32) -> (i32, i32) {
    %c0_i32 = arith.constant 0 : i32
    %c0_i32_0 = arith.constant 0 : i32
    return %c0_i32, %arg0 : i32, i32
  }
}

</mosaic_0001>

<bundles_post_ra>
// kernel: tpu_custom_call.1
= control target key start
LH: loop header
LB: loop body
LE: loop exit
PB: predicated region body
PF: predicated region fallthrough
CT: control target
= control target key end

     0   :  { %9 = vsyncpa [#allocation3], 0  ;;  %s2017_s0 = inlined_call_operand.vmem [shape: s32[8,1], index: 0, kind: input, shape index: {}]   ;;  %s2018_s1 = inlined_call_operand.vmem [shape: s32[8,1], index: 1, kind: input, shape index: {}]   ;;  %s2019_s2 = inlined_call_operand.vmem [shape: f32[16,32], index: 2, kind: input, shape index: {}]   ;;  %s2020_s3 = inlined_call_operand.hbm [shape: f32[16,32], index: 3, kind: input, shape index: {}]   ;;  %s2021_s4 = inlined_call_operand.hbm [shape: f32[1,8], index: 4, kind: output, shape index: {}]  }
   0x1   :  { %10 = vsyncpa [#allocation4], 0  ;;  %s1847_s15 = smov [#allocation2]   ;;  %s1799_s19 = scalar_lea.hbm %s2020_s3, 256 }
   0x2   :  { %s22_s16 = sshll.u32 %s1847_s15, 4  ;;  %p1800_p0 = scmp.ne.s32.totalorder %s2020_s3, %s1799_s19  ;;  %s23_s16 = int_to_ptr.vmem [resolvable:$true] %s22_s16 }
   0x3   :  { %p1803_p1 = scmp.lt.u32.totalorder %s1799_s19, %s2020_s3 }
   0x5   :  { %p1805_p2 = pnand %p1803_p1, %p1800_p0 }
   0x7   :  { %1808 = shalt.err (!%p1805_p2)
}
   0x8   :  { %s1809_s24 = scalar_lea.vmem %s23_s16, 256  ;;  %p1814_p4 = scmp.lt.s32.totalorder %s23_s16, %s23_s16 }
   0x9   :  { %p1810_p3 = scmp.ne.s32.totalorder %s23_s16, %s1809_s24  ;;  %p1815_p5 = scmp.lt.s32.totalorder %s1809_s24, %s1809_s24 }
   0xb   :  { %p1816_p6 = por %p1815_p5, %p1814_p4 }
   0xd   :  { %p1817_p7 = pnand %p1816_p6, %p1810_p3 }
   0xf   :  { %1820 = shalt.err (!%p1817_p7)
}
  0x10   :  { %s1848_s25 = smov 128   ;;  %s1849_s26 = smov 8  }
  0x11   :  { %28 = dma.hbm_to_vmem [thread:$0]  %s2020_s3, 256, %s23_s16, [#allocation3], %s1848_s25, %s1848_s25, %s1849_s26  }
  0x12   :  { %1843 = dma.done.wait [#allocation3], 256  }
  0x13   :  { %1844 = vsyncadd [#allocation3], 4294967040  ;;  %v1850_v0 = vmov 0   ;;  %v32_v1 = vld [vmem:[%s2017_s0] sm:$0xff]  ;;  %v42_v4 = vld [vmem:[%s2019_s2 + $0x8] sm:$0xff]  ;;  %v1851_v10 = vmov 0.0|0.0   ;;  %v33_v37 = vlaneseq }
  0x14   :  { %1796 = vset.pattern.permute.xlu0 %v1850_v0  ;;  %v506_v2 = vld [vmem:[%s2018_s1] sm:$0xff]  ;;  %v51_v6 = vand.u32 4294901760, %v42_v4  ;;  %1703 = vmatprep.subr.bf16.mxu0 %v1851_v10  ;;  %v513_v11 = vld [vmem:[#allocation2] sm:$0xff]  ;;  %vm1852_vm0 = vmmov 0   ;;  %v1853_v13 = vmov 0.0   ;;  %vm43_vm1 = vcmask 130048  }
  0x15   :  { %36 = vperm.xlu0 %1796, %v32_v1   ;;  %v41_v3 = vld [vmem:[%s2019_s2] sm:$0xff]  ;;  %1721 = vmatprep.subr.bf16.mxu1 %v1851_v10  ;;  %v519_v14 = vand.u32 4294901760, %v513_v11  ;;  %v34_v38 = vand.u32 127, %v33_v37  ;;  %vm980_vm4 = vcmask 261120   ;;  %s1855_s0 = smov 120   ;;  %s1856_s1 = smov [#allocation5]  }
  0x16   :  { %v48_v5 = vand.u32 4294901760, %v41_v3  ;;  %v1911_v9 = vsub.f32 %v42_v4, %v51_v6  ;;  %v514_v12 = vld [vmem:[#allocation2 + $0x8] sm:$0xff]  ;;  %1569 = vmatprep.mubr.msk.f32.mxu0 %vm1852_vm0, %v1853_v13  ;;  %1611 = vmatprep.mubr.msk.f32.mxu1 %vm1852_vm0, %v1853_v13  ;;  %v982_v57 = vsel %vm980_vm4, 1.0, %v1850_v0  ;;  %s1485_s2 = sshll.u32 %s1856_s1, 4  ;;  %vm1477_vm5 = vcmask 57344   ;;  %s1486_s2 = int_to_ptr.vmem [resolvable:$true] %s1485_s2 }
  0x17   :  { %v522_v15 = vand.u32 4294901760, %v514_v12  ;;  %v597_v19 = vsub.f32 %v513_v11, %v519_v14  ;;  %v1062_v63 = vsub.f32 %v982_v57, %v982_v57  ;;  %s1821_s10 = scalar_lea.vmem %s1486_s2, 16  ;;  %s1825_s11 = scalar_lea.vmem %s1486_s2, 32 }
  0x18   :  { %v1907_v7 = vpack.c.bf16 %v51_v6, %v48_v5  ;;  %v1909_v8 = vsub.f32 %v41_v3, %v48_v5  ;;  %v134_v17 = vand.u32 4294901760, %v1911_v9  ;;  %p1822_p8 = scmp.ne.s32.totalorder %s1486_s2, %s1821_s10  ;;  %p1826_p9 = scmp.lt.s32.totalorder %s1486_s2, %s1486_s2 }
  0x19   :  { %508 = vperm.xlu0 %1796, %v506_v2   ;;  %v1923_v18 = vpack.c.bf16 %v522_v15, %v519_v14  ;;  %v604_v20 = vsub.f32 %v514_v12, %v522_v15  ;;  %v598_v24 = vand.u32 4294901760, %v597_v19  ;;  %p1827_p10 = scmp.lt.s32.totalorder %s1825_s11, %s1821_s10 }
  0x1a   :  { %1705 = vmatpush3.bf16.msra.mxu0 %v1907_v7  ;;  %v127_v16 = vand.u32 4294901760, %v1909_v8  ;;  %v135_v22 = vsub.f32 %v1911_v9, %v134_v17  ;;  %v1710_v33 = vpack.c.bf16 %v1911_v9, %v1909_v8 }
  0x1b   :  { %1706 = vmatprep.subr.bf16.mxu0 %v1851_v10  ;;  %1723 = vmatpush3.bf16.msra.mxu1 %v1923_v18  ;;  %v605_v25 = vand.u32 4294901760, %v604_v20  ;;  %v599_v27 = vsub.f32 %v597_v19, %v598_v24  ;;  %v1728_v34 = vpack.c.bf16 %v604_v20, %v597_v19  ;;  %p1828_p11 = por %p1827_p10, %p1826_p9 }
  0x1c   :  { %v128_v21 = vsub.f32 %v1909_v8, %v127_v16  ;;  %1724 = vmatprep.subr.bf16.mxu1 %v1851_v10  ;;  %v136_v26 = vand.u32 4294901760, %v135_v22  ;;  %v1716_v35 = vpack.c.bf16 %v134_v17, %v127_v16 }
  0x1d   :  { %v606_v28 = vsub.f32 %v604_v20, %v605_v25  ;;  %v600_v30 = vand.u32 4294901760, %v599_v27  ;;  %v1734_v36 = vpack.c.bf16 %v605_v25, %v598_v24  ;;  %v1854_v25 = vmov 1.0   ;;  %p1829_p12 = pnand %p1828_p11, %p1822_p8 }
  0x1e   :  { %v129_v23 = vand.u32 4294901760, %v128_v21 }
  0x1f   :  { %v607_v31 = vand.u32 4294901760, %v606_v28 }
  0x20   :  { %v1707_v29 = vpack.c.bf16 %v136_v26, %v129_v23 }
  0x21   :  { %v1725_v32 = vpack.c.bf16 %v607_v31, %v600_v30 }
  0x94   :  { %v37_v39 = vpop.permute.xlu0 %36 }
  0x95   :  { %vm38_vm2 = vcmp.eq.s32.totalorder %v37_v39, %v34_v38 }
  0x96   :  { %v1494_v40 = vsel %vm38_vm2, 1.0, %v1853_v13 }
  0x97   :  { %v45_v41 = vsel %vm43_vm1, %v1494_v40, 0 }
  0x98   :  { %v115_v42 = vsub.f32 %v45_v41, %v45_v41  ;;  %v509_v43 = vpop.permute.xlu0 %508 }
  0x99   :  { %vm510_vm3 = vcmp.eq.s32.totalorder %v509_v43, %v34_v38 }
  0x9a   :  { %v1498_v44 = vsel %vm510_vm3, 1.0, %v1853_v13  ;;  %v116_v45 = vand.u32 4294901760, %v115_v42 }
  0x9b   :  { %v516_v46 = vsel %vm43_vm1, %v1498_v44, 0 }
  0x9c   :  { %v586_v47 = vsub.f32 %v516_v46, %v516_v46  ;;  %v117_v48 = vsub.f32 %v115_v42, %v116_v45 }
  0x9e   :  { %v118_v49 = vand.u32 4294901760, %v117_v48  ;;  %v587_v50 = vand.u32 4294901760, %v586_v47 }
  0xa0   :  { %1570 = vmatmul.mubr.f32.vlgmr.msra.gmra.mrb[0].mxu0 %v118_v49  ;;  %v588_v51 = vsub.f32 %v586_v47, %v587_v50 }
  0xa1   :  { %1708 = vmatpush3.bf16.msra.mxu0 %v1707_v29  ;;  %1576 = vmatprep.mubr.msk.f32.mxu0 %vm1852_vm0, %v1853_v13 }
  0xa2   :  { %v589_v52 = vand.u32 4294901760, %v588_v51  ;;  %1709 = vmatprep.subr.bf16.mxu0 %v1851_v10 }
  0xa4   :  { %1612 = vmatmul.mubr.f32.vlgmr.msra.gmra.mrb[0].mxu1 %v589_v52 }
  0xa5   :  { %1726 = vmatpush3.bf16.msra.mxu1 %v1725_v32  ;;  %1618 = vmatprep.mubr.msk.f32.mxu1 %vm1852_vm0, %v1853_v13 }
  0xa6   :  { %1727 = vmatprep.subr.bf16.mxu1 %v1851_v10 }
  0xa8   :  { %1577 = vmatmul.mubr.msk.f32.vlgmr.msra.gmra.mrb[0].mxu0 %vm43_vm1, %v1494_v40 }
  0xa9   :  { %1711 = vmatpush3.bf16.msra.mxu0 %v1710_v33  ;;  %1583 = vmatprep.mubr.msk.f32.mxu0 %vm1852_vm0, %v1853_v13 }
  0xaa   :  { %1712 = vmatprep.subr.bf16.mxu0 %v1851_v10 }
  0xac   :  { %1619 = vmatmul.mubr.msk.f32.vlgmr.msra.gmra.mrb[0].mxu1 %vm43_vm1, %v1498_v44 }
  0xad   :  { %1729 = vmatpush3.bf16.msra.mxu1 %v1728_v34  ;;  %1625 = vmatprep.mubr.msk.f32.mxu1 %vm1852_vm0, %v1853_v13 }
  0xae   :  { %1730 = vmatprep.subr.bf16.mxu1 %v1851_v10 }
  0xb0   :  { %1584 = vmatmul.mubr.f32.vlgmr.msra.gmra.mrb[0].mxu0 %v115_v42 }
  0xb1   :  { %1714 = vmatpush3.bf16.msra.mxu0 %v1907_v7  ;;  %1590 = vmatprep.mubr.msk.f32.mxu0 %vm1852_vm0, %v1853_v13 }
  0xb2   :  { %1715 = vmatprep.subr.bf16.mxu0 %v1851_v10 }
  0xb4   :  { %1626 = vmatmul.mubr.f32.vlgmr.msra.gmra.mrb[0].mxu1 %v586_v47 }
  0xb5   :  { %1732 = vmatpush3.bf16.msra.mxu1 %v1923_v18  ;;  %1632 = vmatprep.mubr.msk.f32.mxu1 %vm1852_vm0, %v1853_v13 }
  0xb6   :  { %1733 = vmatprep.subr.bf16.mxu1 %v1851_v10 }
  0xb8   :  { %1591 = vmatmul.mubr.f32.vlgmr.msra.gmra.mrb[0].mxu0 %v116_v45 }
  0xb9   :  { %1717 = vmatpush3.bf16.msra.mxu0 %v1716_v35  ;;  %1597 = vmatprep.mubr.msk.f32.mxu0 %vm1852_vm0, %v1853_v13 }
  0xba   :  { %1718 = vmatprep.subr.bf16.mxu0 %v1851_v10 }
  0xbc   :  { %1633 = vmatmul.mubr.f32.vlgmr.msra.gmra.mrb[0].mxu1 %v587_v50 }
  0xbd   :  { %1735 = vmatpush3.bf16.msra.mxu1 %v1734_v36  ;;  %1639 = vmatprep.mubr.msk.f32.mxu1 %vm1852_vm0, %v1853_v13 }
  0xbe   :  { %1736 = vmatprep.subr.bf16.mxu1 %v1851_v10 }
  0xc0   :  { %1598 = vmatmul.mubr.msk.f32.vlgmr.msra.gmra.mrb[0].mxu0 %vm43_vm1, %v1494_v40 }
  0xc1   :  { %1720 = vmatpush3.bf16.msra.mxu0 %v1907_v7  ;;  %1604 = vmatprep.mubr.msk.f32.mxu0 %vm1852_vm0, %v1853_v13  ;;  %v1063_v7 = vand.u32 4294901760, %v1062_v63 }
  0xc2   :  { %1748 = vmatprep.subr.bf16.mxu0 %v1851_v10 }
  0xc3   :  { %v1064_v16 = vsub.f32 %v1062_v63, %v1063_v7 }
  0xc4   :  { %1640 = vmatmul.mubr.msk.f32.vlgmr.msra.gmra.mrb[0].mxu1 %vm43_vm1, %v1498_v44 }
  0xc5   :  { %1738 = vmatpush3.bf16.msra.mxu1 %v1923_v18  ;;  %1646 = vmatprep.mubr.msk.f32.mxu1 %vm1852_vm0, %v1853_v13  ;;  %v1065_v21 = vand.u32 4294901760, %v1064_v16 }
  0xc6   :  { %1739 = vmatprep.subr.bf16.mxu1 %v1851_v10 }
  0xc8   :  { %1605 = vmatmul.mubr.msk.f32.vlgmr.msra.gmra.mrb[0].mxu0 %vm43_vm1, %v1494_v40 }
  0xc9   :  { %1682 = vmatprep.mubr.msk.f32.mxu0 %vm1852_vm0, %v1853_v13 }
  0xcc   :  { %1647 = vmatmul.mubr.msk.f32.vlgmr.msra.gmra.mrb[0].mxu1 %vm43_vm1, %v1498_v44 }
  0xcd   :  { %1655 = vmatprep.mubr.msk.f32.mxu1 %vm1852_vm0, %v1853_v13 }
 0x19b   :  { %v502_v53 = vpop.f32.mrb[0].mxu0 }
 0x19c   :  { %v978_v54 = vmul.f32 %v502_v53, %v502_v53  ;;  %v1606_v55 = vpop.f32.mrb[1].mxu0 }
 0x19e   :  { %v988_v56 = vsel %vm980_vm4, %v978_v54, 0 }
 0x19f   :  { %v997_v58 = vand.u32 4294901760, %v988_v56  ;;  %v973_v59 = vpop.f32.mrb[0].mxu1 }
 0x1a0   :  { %v977_v60 = vmul.f32 %v973_v59, %v502_v53  ;;  %v1648_v61 = vpop.f32.mrb[1].mxu1  ;;  %v979_v1 = vmul.f32 %v973_v59, %v973_v59 }
 0x1a1   :  { %v1080_v62 = vsub.f32 %v988_v56, %v997_v58 }
 0x1a2   :  { %v985_v2 = vsel %vm980_vm4, %v977_v60, 0  ;;  %v991_v8 = vsel %vm980_vm4, %v979_v1, 0 }
 0x1a3   :  { %v1081_v3 = vand.u32 4294901760, %v1080_v62  ;;  %v994_v4 = vand.u32 4294901760, %v985_v2  ;;  %v1000_v12 = vand.u32 4294901760, %v991_v8 }
 0x1a5   :  { %v1740_v5 = vpack.c.bf16 %v997_v58, %v994_v4  ;;  %v1073_v6 = vsub.f32 %v985_v2, %v994_v4  ;;  %v1082_v9 = vsub.f32 %v1080_v62, %v1081_v3  ;;  %v1087_v19 = vsub.f32 %v991_v8, %v1000_v12 }
 0x1a7   :  { %v1074_v11 = vand.u32 4294901760, %v1073_v6  ;;  %1741 = vmatpush3.bf16.xpose.msra.mxu1 %v1740_v5  ;;  %1750 = vmatpush3.bf16.xpose.msra.mxu0 %v1740_v5  ;;  %v1746_v0 = vpack.c.bf16 %v1080_v62, %v1073_v6  ;;  %v1083_v18 = vand.u32 4294901760, %v1082_v9  ;;  %v1088_v22 = vand.u32 4294901760, %v1087_v19 }
 0x1a8   :  { %1653 = vmatprep.subr.mxu1 %v1853_v13  ;;  %1680 = vmatprep.subr.mxu0 %v1853_v13 }
 0x1a9   :  { %v1075_v14 = vsub.f32 %v1073_v6, %v1074_v11  ;;  %v1752_v15 = vpack.c.bf16 %v1081_v3, %v1074_v11  ;;  %v1089_v23 = vsub.f32 %v1087_v19, %v1088_v22 }
 0x1ab   :  { %v1076_v17 = vand.u32 4294901760, %v1075_v14  ;;  %v1090_v24 = vand.u32 4294901760, %v1089_v23 }
 0x1ad   :  { %v1743_v20 = vpack.c.bf16 %v1083_v18, %v1076_v17 }
 0x1af   :  { %1654 = vmatpush3.xpose.msra.mxu1 %v1000_v12  ;;  %1681 = vmatpush3.xpose.msra.mxu0 %v1000_v12 }
 0x1b0   :  { %1742 = vmatprep.subr.bf16.mxu1 %v1851_v10  ;;  %1751 = vmatprep.subr.bf16.mxu0 %v1851_v10 }
 0x1b2   :  { %1656 = vmatmul.mubr.f32.vlgmr.msra.gmra.mrb[2].mxu1 %v1065_v21  ;;  %1683 = vmatmul.mubr.f32.vlgmr.msra.gmra.mrb[2].mxu0 %v1063_v7 }
 0x1b3   :  { %1744 = vmatpush3.bf16.xpose.msra.mxu1 %v1743_v20  ;;  %1753 = vmatpush3.bf16.xpose.msra.mxu0 %v1752_v15 }
 0x1b4   :  { %1662 = vmatprep.subr.mxu1 %v1853_v13  ;;  %1689 = vmatprep.subr.mxu0 %v1853_v13 }
 0x1b5   :  { %1664 = vmatprep.mubr.msk.f32.mxu1 %vm1852_vm0, %v1853_v13  ;;  %1691 = vmatprep.mubr.msk.f32.mxu0 %vm1852_vm0, %v1853_v13 }
 0x1bb   :  { %1663 = vmatpush3.xpose.msra.mxu1 %v1090_v24  ;;  %1690 = vmatpush3.xpose.msra.mxu0 %v1088_v22 }
 0x1bc   :  { %1745 = vmatprep.subr.bf16.mxu1 %v1851_v10  ;;  %1754 = vmatprep.subr.bf16.mxu0 %v1851_v10 }
 0x1be   :  { %1665 = vmatmul.mubr.msk.f32.vlgmr.msra.gmra.mrb[2].mxu1 %vm980_vm4, %v1854_v25  ;;  %1692 = vmatmul.mubr.msk.f32.vlgmr.msra.gmra.mrb[2].mxu0 %vm980_vm4, %v1854_v25 }
 0x1bf   :  { %1747 = vmatpush3.bf16.xpose.msra.mxu1 %v1746_v0  ;;  %1756 = vmatpush3.bf16.xpose.msra.mxu0 %v1740_v5 }
 0x1c0   :  { %1671 = vmatprep.subr.mxu1 %v1853_v13  ;;  %1698 = vmatprep.subr.mxu0 %v1853_v13 }
 0x1c1   :  { %1673 = vmatprep.mubr.msk.f32.mxu1 %vm1852_vm0, %v1853_v13  ;;  %1700 = vmatprep.mubr.msk.f32.mxu0 %vm1852_vm0, %v1853_v13 }
 0x1c7   :  { %1672 = vmatpush3.xpose.msra.mxu1 %v1087_v19  ;;  %1699 = vmatpush3.xpose.msra.mxu0 %v1000_v12 }
 0x1ca   :  { %1674 = vmatmul.mubr.f32.vlgmr.msra.gmra.mrb[2].mxu1 %v1062_v63  ;;  %1701 = vmatmul.mubr.msk.f32.vlgmr.msra.gmra.mrb[2].mxu0 %vm980_vm4, %v1854_v25 }
 0x29d   :  { %v1231_v10 = vpop.f32.mrb[2].mxu1  ;;  %v1461_v26 = vpop.f32.mrb[2].mxu0 }
 0x29e   :  { %v1757_v27 = vadd.f32 %v1461_v26, %v1231_v10  ;;  %v1675_v28 = vpop.f32.mrb[3].mxu1  ;;  %v1702_v29 = vpop.f32.mrb[3].mxu0 }
 0x2a0   :  { %1466 = vrot.lane.b32.xlu1 %v1757_v27, %s1855_s0 }
 0x312   :  { %v1467_v30 = vpop.permute.xlu1 %1466 }
 0x313   :  { %v1469_v31 = vmul.f32 %v1757_v27, %v1467_v30 }
 0x315   :  { %v1470_v32 = vmax.f32 %v1469_v31, 1e-16 }
 0x317   :  { %1797 = vrsqrt.f32 %v1470_v32 }
 0x321   :  { %v1798_v33 = vpop.eup %1797 }
 0x322   :  { %1473 = vrot.lane.b32.xlu1 %v1798_v33, %s1855_s0 }
 0x394   :  { %v1474_v13 = vpop.permute.xlu1 %1473 }
 0x395   :  { %v1476_v34 = vmul.f32 %v1757_v27, %v1474_v13 }
 0x397   :  { %1478 = vst.msk [vmem:[#allocation5] sm:$0x1] %vm1477_vm5, %v1476_v34 }
 0x398   :  { %1832 = shalt.err (!%p1829_p12)
}
 0x399   :  { %s1833_s14 = scalar_lea.hbm %s2021_s4, 16 }
 0x39a   :  { %p1834_p13 = scmp.ne.s32.totalorder %s2021_s4, %s1833_s14  ;;  %p1837_p0 = scmp.lt.u32.totalorder %s1833_s14, %s2021_s4 }
 0x39c   :  { %p1839_p1 = pnand %p1837_p0, %p1834_p13 }
 0x39e   :  { %1842 = shalt.err (!%p1839_p1)
}
 0x39f   :  { %1488 = dma.vmem_to_hbm [thread:$0]  %s1486_s2, 16, %s2021_s4, [#allocation4]  }
 0x3a0   :  { %1845 = dma.done.wait [#allocation4], 16  }
 0x3a1   :  { %1846 = vsyncadd [#allocation4], 4294967280 }
 0x3a2   :  { %1492 = vsyncpa [#allocation3], 1 }
 0x3a3   :  { %1493 = vsyncpa [#allocation4], 1 }

</bundles_post_ra>
